<compile_context>
chip_gen: v5e
topology: v5e:2x2
jax: 0.10.0
libtpu: 0.0.40
codegen_flags: <defaults>
</compile_context>

<pallas_src>
import math

import jax
import jax.numpy as jnp
from jax.experimental import pallas as pl
from jax.experimental.pallas import tpu as pltpu

_LANE = 128          # lane width (last dim alignment)
_SUBLANE_BF16 = 16   # bf16 packs 16 rows per vreg


def _round_up(x, m):
    return (x + m - 1) // m * m


def _largest_divisor_tile(padded, align, max_tile):
    """Largest t with t % align == 0, padded % t == 0, t <= max(max_tile, align)."""
    cap = max(align, (min(max_tile, padded) // align) * align)
    for t in range(cap, align - 1, -align):
        if padded % t == 0:
            return t
    return align


def _select_tiles(M, K, N, *, max_tm, max_tn, max_tk,
                  out_itemsize, compute_itemsize=2,
                  vmem_budget_bytes=20 * 1024 * 1024):
    """Pick padded dims (minimal alignment) and tiles that divide them exactly."""
    Mp = _round_up(max(M, _SUBLANE_BF16), _SUBLANE_BF16)
    Kp = _round_up(max(K, _LANE), _LANE)
    Np = _round_up(max(N, _LANE), _LANE)

    tm = _largest_divisor_tile(Mp, _SUBLANE_BF16, max_tm)
    tn = _largest_divisor_tile(Np, _LANE, max_tn)
    tk = _largest_divisor_tile(Kp, _LANE, max_tk)

    def usage(tm_, tn_, tk_):
        single_k = tk_ == Kp
        x_b = tm_ * tk_ * compute_itemsize
        w_b = tk_ * tn_ * compute_itemsize
        o_b = tm_ * tn_ * out_itemsize
        vec_b = 2 * tn_ * 4                       # scale + shift rows
        acc_b = 0 if single_k else tm_ * tn_ * 4  # f32 accumulator scratch
        return 2 * (x_b + w_b + o_b + vec_b) + acc_b   # 2x for double-buffering

    # Shrink the largest tile until the double-buffered working set fits VMEM.
    while usage(tm, tn, tk) > vmem_budget_bytes:
        if tk >= max(tm, tn) and tk > _LANE:
            tk = _largest_divisor_tile(Kp, _LANE, tk // 2)
        elif tm >= tn and tm > _SUBLANE_BF16:
            tm = _largest_divisor_tile(Mp, _SUBLANE_BF16, tm // 2)
        elif tn > _LANE:
            tn = _largest_divisor_tile(Np, _LANE, tn // 2)
        else:
            break

    # v7x has 2 TensorCores: make sure the parallel (M, N) grid has >= 2 tiles
    # whenever the problem allows a split.
    if (Mp // tm) * (Np // tn) == 1:
        if Mp // _SUBLANE_BF16 >= 2:
            tm = _largest_divisor_tile(Mp, _SUBLANE_BF16, Mp // 2)
        elif Np // _LANE >= 2:
            tn = _largest_divisor_tile(Np, _LANE, Np // 2)

    return Mp, Kp, Np, tm, tk, tn


# ----------------------------------------------------------------------------
# Pallas kernels: fused relu((x @ W) * scale + shift)
# ----------------------------------------------------------------------------
def _dbrd_kernel_single_k(x_ref, w_ref, scale_ref, shift_ref, o_ref):
    acc = jnp.dot(x_ref[...], w_ref[...], preferred_element_type=jnp.float32)
    y = acc * scale_ref[...] + shift_ref[...]
    o_ref[...] = jnp.maximum(y, 0.0).astype(o_ref.dtype)


def _dbrd_kernel_multi_k(x_ref, w_ref, scale_ref, shift_ref, o_ref, acc_ref):
    k = pl.program_id(2)

    @pl.when(k == 0)
    def _():
        acc_ref[...] = jnp.zeros_like(acc_ref)

    acc_ref[...] += jnp.dot(x_ref[...], w_ref[...],
                            preferred_element_type=jnp.float32)

    @pl.when(k == pl.num_programs(2) - 1)
    def _():
        y = acc_ref[...] * scale_ref[...] + shift_ref[...]
        o_ref[...] = jnp.maximum(y, 0.0).astype(o_ref.dtype)


# ----------------------------------------------------------------------------
# Parameter preparation (done once, outside the forward path)
# ----------------------------------------------------------------------------
def prepare_dbrd_params(w, b, gamma, beta, running_mean, running_var,
                        eps=1e-5, compute_dtype=jnp.bfloat16):
    """w: (out_features, in_features) PyTorch Linear weight, b: (out_features,)."""
    out_features, in_features = w.shape

    # Eval-mode BN folded into a per-output-column f32 scale/shift (applied in the
    # kernel epilogue; weights stay unscaled bf16 to avoid double rounding).
    scale = (gamma / jnp.sqrt(running_var + eps)).astype(jnp.float32)        # (N,)
    shift = ((b - running_mean) * scale + beta).astype(jnp.float32)          # (N,)

    Kp = _round_up(max(in_features, _LANE), _LANE)
    Np = _round_up(max(out_features, _LANE), _LANE)

    w_t = w.T.astype(compute_dtype)                                          # (K, N)
    if (Kp, Np) != (in_features, out_features):
        w_t = jnp.pad(w_t, ((0, Kp - in_features), (0, Np - out_features)))
        scale = jnp.pad(scale, (0, Np - out_features))
        shift = jnp.pad(shift, (0, Np - out_features))

    return {
        "w": w_t,                         # (Kp, Np) bf16, pre-transposed & padded
        "scale": scale.reshape(1, Np),    # (1, Np) f32
        "shift": shift.reshape(1, Np),    # (1, Np) f32
        "in_features": in_features,
        "out_features": out_features,
    }


# ----------------------------------------------------------------------------
# Forward
# ----------------------------------------------------------------------------
def dbrd_forward(x, params, *, out_dtype=jnp.float32,
                 max_tm=512, max_tn=512, max_tk=2048):
    """x: (batch, in_features) -> (batch, out_features)."""
    M, K = x.shape
    assert K == params["in_features"]
    Kp, Np = params["w"].shape
    N = params["out_features"]

    Mp, Kp2, Np2, tm, tk, tn = _select_tiles(
        M, K, N, max_tm=max_tm, max_tn=max_tn, max_tk=max_tk,
        out_itemsize=jnp.dtype(out_dtype).itemsize)
    assert (Kp2, Np2) == (Kp, Np)

    dt = params["w"].dtype
    x_c = x.astype(dt)
    if (Mp, Kp) != (M, K):                       # pad only when actually needed
        x_c = jnp.pad(x_c, ((0, Mp - M), (0, Kp - K)))

    cp = pltpu.CompilerParams(
        dimension_semantics=("parallel", "parallel") if tk == Kp
        else ("parallel", "parallel", "arbitrary"),
        vmem_limit_bytes=32 * 1024 * 1024,
    )

    if tk == Kp:
        # Single-K fast path: no accumulator scratch, no reduction axis.
        out = pl.pallas_call(
            _dbrd_kernel_single_k,
            out_shape=jax.ShapeDtypeStruct((Mp, Np), out_dtype),
            grid_spec=pltpu.PrefetchScalarGridSpec(
                num_scalar_prefetch=0,
                grid=(Mp // tm, Np // tn),
                in_specs=[
                    pl.BlockSpec((tm, Kp), lambda i, j: (i, 0)),
                    pl.BlockSpec((Kp, tn), lambda i, j: (0, j)),
                    pl.BlockSpec((1, tn), lambda i, j: (0, j)),
                    pl.BlockSpec((1, tn), lambda i, j: (0, j)),
                ],
                out_specs=pl.BlockSpec((tm, tn), lambda i, j: (i, j)),
            ),
            compiler_params=cp,
        )(x_c, params["w"], params["scale"], params["shift"])
    else:
        # K-reduction path with an f32 VMEM accumulator.
        out = pl.pallas_call(
            _dbrd_kernel_multi_k,
            out_shape=jax.ShapeDtypeStruct((Mp, Np), out_dtype),
            grid_spec=pltpu.PrefetchScalarGridSpec(
                num_scalar_prefetch=0,
                grid=(Mp // tm, Np // tn, Kp // tk),
                in_specs=[
                    pl.BlockSpec((tm, tk), lambda i, j, k: (i, k)),
                    pl.BlockSpec((tk, tn), lambda i, j, k: (k, j)),
                    pl.BlockSpec((1, tn), lambda i, j, k: (0, j)),
                    pl.BlockSpec((1, tn), lambda i, j, k: (0, j)),
                ],
                out_specs=pl.BlockSpec((tm, tn), lambda i, j, k: (i, j)),
                scratch_shapes=[pltpu.VMEM((tm, tn), jnp.float32)],
            ),
            compiler_params=cp,
        )(x_c, params["w"], params["scale"], params["shift"])

    # Dropout: eval-mode identity (see TODO at top of file).
    if (Mp, Np) != (M, N):
        out = out[:M, :N]
    return out


# ----------------------------------------------------------------------------
# Demo / self-check
# ----------------------------------------------------------------------------
if __name__ == "__main__":
    key = jax.random.PRNGKey(0)
    kx, kw, kb, kg, kbe, km, kv = jax.random.split(key, 7)

    batch, in_features, out_features = 8, 64, 32
    x = jax.random.normal(kx, (batch, in_features), jnp.float32)

    # PyTorch nn.Linear default init: U(-1/sqrt(fan_in), 1/sqrt(fan_in))
    bound = 1.0 / math.sqrt(in_features)
    w = jax.random.uniform(kw, (out_features, in_features), jnp.float32, -bound, bound)
    b = jax.random.uniform(kb, (out_features,), jnp.float32, -bound, bound)

    # Non-trivial eval-mode BatchNorm1d statistics to exercise the BN fold.
    gamma = 1.0 + 0.1 * jax.random.normal(kg, (out_features,), jnp.float32)
    beta = 0.1 * jax.random.normal(kbe, (out_features,), jnp.float32)
    running_mean = 0.1 * jax.random.normal(km, (out_features,), jnp.float32)
    running_var = jnp.abs(1.0 + 0.1 * jax.random.normal(kv, (out_features,), jnp.float32))

    params = prepare_dbrd_params(w, b, gamma, beta, running_mean, running_var)

    out = jax.block_until_ready(dbrd_forward(x, params))

    # f32 reference (kernel uses bf16 MXU inputs -> loosened tolerance)
    eps = 1e-5
    scale = gamma / jnp.sqrt(running_var + eps)
    ref = jnp.maximum(((x @ w.T + b) - running_mean) * scale + beta, 0.0)

    assert out.shape == (batch, out_features)
    assert bool(jnp.all(jnp.isfinite(out)))
    assert bool(jnp.allclose(out, ref, atol=3e-2, rtol=3e-2)), \
        float(jnp.max(jnp.abs(out - ref)))
    print("KERNEL_OK")
</pallas_src>

<mosaic_0001>
module attributes {stable_mosaic.version = 11 : i64} {
  func.func @_dbrd_kernel_single_k(%arg0: i32, %arg1: i32, %arg2: memref<16x128xbf16, #tpu.memory_space<vmem>>, %arg3: memref<128x128xbf16, #tpu.memory_space<vmem>>, %arg4: memref<1x128xf32, #tpu.memory_space<vmem>>, %arg5: memref<1x128xf32, #tpu.memory_space<vmem>>, %arg6: memref<16x128xf32, #tpu.memory_space<vmem>>) attributes {dimension_semantics = [#tpu.dimension_semantics<parallel>, #tpu.dimension_semantics<parallel>], iteration_bounds = array<i64: 1, 1>, scalar_prefetch = 0 : i64, scratch_operands = 0 : i64, tpu.core_type = #tpu.core_type<tc>, window_params = [{transform_indices = @transform_0, window_bounds = array<i64: 16, 128>}, {transform_indices = @transform_1, window_bounds = array<i64: 128, 128>}, {transform_indices = @transform_2, window_bounds = array<i64: 1, 128>}, {transform_indices = @transform_3, window_bounds = array<i64: 1, 128>}, {transform_indices = @transform_4, window_bounds = array<i64: 16, 128>}]} {
    %c0 = arith.constant 0 : index
    %c0_0 = arith.constant 0 : index
    %0 = vector.load %arg2[%c0, %c0_0] : memref<16x128xbf16, #tpu.memory_space<vmem>>, vector<16x128xbf16>
    %c0_1 = arith.constant 0 : index
    %c0_2 = arith.constant 0 : index
    %1 = vector.load %arg3[%c0_1, %c0_2] : memref<128x128xbf16, #tpu.memory_space<vmem>>, vector<128x128xbf16>
    %cst = arith.constant dense<0.000000e+00> : vector<16x128xf32>
    %2 = tpu.matmul %0, %1, %cst {dimension_numbers = #tpu.dot_dimension_numbers<[1], [0], [0], [1], [0, 0, 1, 1], [], []>} : vector<16x128xbf16>, vector<128x128xbf16>, vector<16x128xf32> -> vector<16x128xf32>
    %c0_3 = arith.constant 0 : index
    %c0_4 = arith.constant 0 : index
    %3 = vector.load %arg4[%c0_3, %c0_4] : memref<1x128xf32, #tpu.memory_space<vmem>>, vector<1x128xf32>
    %4 = vector.broadcast %3 : vector<1x128xf32> to vector<16x128xf32>
    %5 = arith.mulf %2, %4 : vector<16x128xf32>
    %c0_5 = arith.constant 0 : index
    %c0_6 = arith.constant 0 : index
    %6 = vector.load %arg5[%c0_5, %c0_6] : memref<1x128xf32, #tpu.memory_space<vmem>>, vector<1x128xf32>
    %7 = vector.broadcast %6 : vector<1x128xf32> to vector<16x128xf32>
    %8 = arith.addf %5, %7 : vector<16x128xf32>
    %cst_7 = arith.constant 0.000000e+00 : f32
    %9 = vector.broadcast %cst_7 : f32 to vector<16x128xf32>
    %10 = arith.maximumf %8, %9 : vector<16x128xf32>
    %c0_8 = arith.constant 0 : index
    %c0_9 = arith.constant 0 : index
    %11 = vector.load %arg6[%c0_8, %c0_9] : memref<16x128xf32, #tpu.memory_space<vmem>>, vector<16x128xf32>
    tpu.vector_store %arg6[%c0_8, %c0_9], %10 {strides = array<i32>} : memref<16x128xf32, #tpu.memory_space<vmem>>, vector<16x128xf32>,
    return
  }
  func.func @transform_0(%arg0: i32, %arg1: i32) -> (i32, i32) {
    %c0_i32 = arith.constant 0 : i32
    %c0_i32_0 = arith.constant 0 : i32
    return %arg0, %c0_i32 : i32, i32
  }
  func.func @transform_1(%arg0: i32, %arg1: i32) -> (i32, i32) {
    %c0_i32 = arith.constant 0 : i32
    %c0_i32_0 = arith.constant 0 : i32
    return %c0_i32, %arg1 : i32, i32
  }
  func.func @transform_2(%arg0: i32, %arg1: i32) -> (i32, i32) {
    %c0_i32 = arith.constant 0 : i32
    %c0_i32_0 = arith.constant 0 : i32
    return %c0_i32, %arg1 : i32, i32
  }
  func.func @transform_3(%arg0: i32, %arg1: i32) -> (i32, i32) {
    %c0_i32 = arith.constant 0 : i32
    %c0_i32_0 = arith.constant 0 : i32
    return %c0_i32, %arg1 : i32, i32
  }
  func.func @transform_4(%arg0: i32, %arg1: i32) -> (i32, i32) {
    %c0_i32 = arith.constant 0 : i32
    return %arg0, %arg1 : i32, i32
  }
}

</mosaic_0001>

<bundles_post_ra>
// kernel: tpu_custom_call.1
= control target key start
LH: loop header
LB: loop body
LE: loop exit
PB: predicated region body
PF: predicated region fallthrough
CT: control target
= control target key end

     0   :  { %9 = vsyncpa [#allocation3], 0  ;;  %s351_s0 = inlined_call_operand.hbm [shape: bf16[16,128], index: 0, kind: input, shape index: {}]   ;;  %s352_s1 = inlined_call_operand.hbm [shape: bf16[128,128], index: 1, kind: input, shape index: {}]   ;;  %s353_s2 = inlined_call_operand.vmem [shape: f32[1,128], index: 2, kind: input, shape index: {}]   ;;  %s354_s3 = inlined_call_operand.vmem [shape: f32[1,128], index: 3, kind: input, shape index: {}]   ;;  %s355_s4 = inlined_call_operand.hbm [shape: f32[16,128], index: 4, kind: output, shape index: {}]  }
   0x1   :  { %10 = vsyncpa [#allocation6], 0 }
   0x2   :  { %11 = vsyncpa [#allocation4], 0  ;;  %s16_s17 = sshll.u32 %s351_s0, 4  ;;  %s304_s18 = smov [#allocation2]   ;;  %s17_s17 = int_to_ptr.hbm [resolvable:$true] %s16_s17 }
   0x3   :  { %s18_s19 = sshll.u32 %s304_s18, 4  ;;  %s29_s22 = sshll.u32 %s352_s1, 4  ;;  %s19_s19 = int_to_ptr.vmem [resolvable:$true] %s18_s19  ;;  %s30_s22 = int_to_ptr.hbm [resolvable:$true] %s29_s22 }
   0x4   :  { %s305_s23 = smov 64   ;;  %s306_s24 = smov 4  }
   0x5   :  { %24 = dma.hbm_to_vmem [thread:$0]  %s17_s17, 128, %s19_s19, [#allocation3], %s305_s23, %s305_s23, %s306_s24  }
   0x6   :  { %s307_s25 = smov [#allocation5]  }
   0x7   :  { %s31_s26 = sshll.u32 %s307_s25, 4  ;;  %s32_s26 = int_to_ptr.vmem [resolvable:$true] %s31_s26 }
   0x8   :  { %37 = dma.hbm_to_vmem [thread:$0]  %s30_s22, 1024, %s32_s26, [#allocation6], %s305_s23, %s305_s23, %s306_s24  }
   0x9   :  { %298 = dma.done.wait [#allocation3], 128  }
   0xa   :  { %299 = vsyncadd [#allocation3], 4294967168 }
   0xb   :  { %300 = dma.done.wait [#allocation6], 1024  }
   0xc   :  { %301 = vsyncadd [#allocation6], 4294966272  ;;  %v216_v0 = vld [vmem:[#allocation5 + $0x38] sm:$0xff]  ;;  %v215_v1 = vld [vmem:[#allocation5 + $0x30] sm:$0xff]  ;;  %s308_s29 = smov [#allocation7]   ;;  %s158_s7 = sshll.u32 %s355_s4, 4  ;;  %s159_s7 = int_to_ptr.hbm [resolvable:$true] %s158_s7 }
   0xd   :  { %122 = vmatpush.bf16.msra.mxu0 %v216_v0  ;;  %v214_v2 = vld [vmem:[#allocation5 + $0x28] sm:$0xff]  ;;  %v213_v3 = vld [vmem:[#allocation5 + $0x20] sm:$0xff]  ;;  %v212_v4 = vld [vmem:[#allocation5 + $0x18] sm:$0xff]  ;;  %s156_s30 = sshll.u32 %s308_s29, 4  ;;  %s157_s30 = int_to_ptr.vmem [resolvable:$true] %s156_s30 }
   0xe   :  { %v211_v5 = vld [vmem:[#allocation5 + $0x10] sm:$0xff]  ;;  %v210_v6 = vld [vmem:[#allocation5 + $0x8] sm:$0xff]  ;;  %v209_v7 = vld [vmem:[#allocation5] sm:$0xff] }
   0xf   :  { %v208_v8 = vld [vmem:[#allocation2] sm:$0xff] }
  0x10   :  { %v224_v9 = vld [vmem:[%s353_s2] ss:$0 sm:$0xff]  ;;  %s309_s2 = smov 128  }
  0x11   :  { %123 = vmatpush.bf16.msra.mxu0 %v215_v1  ;;  %v225_v10 = vld [vmem:[%s354_s3] ss:$0 sm:$0xff]  ;;  %s310_s3 = smov 8  }
  0x15   :  { %124 = vmatpush.bf16.msra.mxu0 %v214_v2 }
  0x19   :  { %125 = vmatpush.bf16.msra.mxu0 %v213_v3 }
  0x1d   :  { %126 = vmatpush.bf16.msra.mxu0 %v212_v4 }
  0x21   :  { %127 = vmatpush.bf16.msra.mxu0 %v211_v5 }
  0x25   :  { %128 = vmatpush.bf16.msra.mxu0 %v210_v6 }
  0x29   :  { %129 = vmatpush.bf16.msra.mxu0 %v209_v7 }
  0x2c   :  { %130 = vmatmul.bf16.vlgmr.msra.gmra.mxu0 %v208_v8 }
  0xa9   :  { %v131_v11 = vpop.f32.mrf.mxu0 }
  0xaa   :  { %v140_v12 = vmul.f32 %v224_v9, %v131_v11 }
  0xac   :  { %v146_v13 = vadd.f32 %v225_v10, %v140_v12 }
  0xae   :  { %v148_v14 = vmax.f32 %v146_v13, 0.0 }
  0xb0   :  { %150 = vst [vmem:[#allocation7] sm:$0xff] %v148_v14 }
  0xb1   :  { %v133_v15 = vpop.f32.mrf.mxu0 }
  0xb2   :  { %v141_v16 = vmul.f32 %v224_v9, %v133_v15 }
  0xb4   :  { %v147_v17 = vadd.f32 %v225_v10, %v141_v16 }
  0xb6   :  { %v149_v18 = vmax.f32 %v147_v17, 0.0 }
  0xb8   :  { %151 = vst [vmem:[#allocation7 + $0x8] sm:$0xff] %v149_v18 }
  0xb9   :  { %164 = dma.vmem_to_hbm [thread:$0]  %s157_s30, 256, %s159_s7, [#allocation4], %s309_s2, %s309_s2, %s310_s3  }
  0xba   :  { %302 = dma.done.wait [#allocation4], 256  }
  0xbb   :  { %303 = vsyncadd [#allocation4], 4294967040 }
  0xbc   :  { %169 = vsyncpa [#allocation3], 1 }
  0xbd   :  { %170 = vsyncpa [#allocation6], 1 }
  0xbe   :  { %171 = vsyncpa [#allocation4], 1 }

</bundles_post_ra>
